<compile_context>
chip_gen: v7x
topology: tpu7x:2x2x1
jax: 0.10.0
libtpu: 0.0.40
codegen_flags: <defaults>
</compile_context>

<pallas_src>
import jax
import jax.numpy as jnp
from jax.experimental import pallas as pl
from jax.experimental.pallas import tpu as pltpu


def _round_up(n, m):
    return ((n + m - 1) // m) * m


def _is_pow2(n):
    return n > 0 and (n & (n - 1)) == 0


def _make_kernel(S, H, L):
    SH = S * H

    def kernel(x_ref, w_bd_ref, b_att_ref, bcast_ref, emean_ref, w_proj_ref,
               b_proj_ref, o_ref):
        f32 = jnp.float32
        x = x_ref[...]                                    # (TB, S*L), streamed dtype

        # (1) Attention scores for every (s, h) in one lane-dense MXU matmul:
        #     scores[b, s*H + h] = sum_l x[b, s, l] * w_att[h, l] + b_att[h]
        scores = jnp.dot(x, w_bd_ref[...], preferred_element_type=f32)
        scores = scores + b_att_ref[...]                  # (TB, S*H), f32

        # (2) Per-head reductions over the sequence, on the s-major / h-minor
        #     lane layout: pairwise halving tree of static lane slices.
        def reduce_over_s(a, is_max):
            op = jnp.maximum if is_max else jnp.add
            if _is_pow2(S):
                width = SH
                while width > H:
                    width //= 2
                    a = op(a[:, :width], a[:, width:])
                return a                                  # (TB, H)
            # TODO(synk): non-power-of-two S falls back to a lane-sparse
            # reshape reduce (correct, slower); not hit by the default config.
            a3 = a.reshape(a.shape[0], S, H)
            return jnp.max(a3, axis=1) if is_max else jnp.sum(a3, axis=1)

        bcast = bcast_ref[...]                            # (H, S*H) one-hot

        m = jnp.dot(reduce_over_s(scores, True), bcast,
                    preferred_element_type=f32)           # per-head max, (TB, S*H)
        e = jnp.exp(scores - m)                           # EUP, lane-dense
        denom = reduce_over_s(e, False)                   # (TB, H)
        inv = 1.0 / denom                                 # exact; only TB*H values
        w = e * jnp.dot(inv, bcast, preferred_element_type=f32)   # softmax weights

        # (3) Fused head-mean + expansion back to the x lane layout (MXU):
        #     wexp[b, s*L + l] = mean_h w[b, s*H + h]
        wexp = jnp.dot(w.astype(x.dtype), emean_ref[...])          # (TB, S*L)

        # (4) Weighted pooling over s fused with the projection matmul:
        #     out[b, m] = sum_{s,l} x[b,s,l] * wbar[b,s] * W_proj[m,l] + b_proj[m]
        out = jnp.dot(x * wexp, w_proj_ref[...], preferred_element_type=f32)
        out = out + b_proj_ref[...]                       # (TB, L), f32

        o_ref[...] = out.astype(o_ref.dtype)

    return kernel


def attention_pooling(x, w_att, b_att, w_proj=None, b_proj=None, *,
                      block_b=2048, stream_dtype=jnp.bfloat16):
    """AttentionPooling forward.

    x: (B, S, L); w_att: (H, L); b_att: (H,); w_proj: (L, L) or None (num_heads==1);
    b_proj: (L,) or None.  `stream_dtype` controls the dtype x is streamed in
    (bf16 halves HBM traffic; accumulation stays f32); None keeps x's dtype.
    """
    B, S, L = x.shape
    H = w_att.shape[0]
    out_dtype = x.dtype
    f32 = jnp.float32

    if w_proj is None:                       # num_heads == 1 path of the module
        w_proj = jnp.eye(L, dtype=f32)
        b_proj = jnp.zeros((L,), f32)

    # Lane-dense presentation of x (free: contiguous row-major reshape).
    x2 = x.reshape(B, S * L)
    if stream_dtype is not None and x2.dtype != stream_dtype:
        # NOTE: if x comes from an upstream op XLA fuses this cast; for a cold
        # f32 array it costs one extra HBM pass.
        x2 = x2.astype(stream_dtype)
    sdt = x2.dtype

    # ---- small resident constant operands (all tiny, built once) -----------
    eye_s = jnp.eye(S, dtype=f32)
    # Block-diagonal attention weight: W_bd[s*L+l, s*H+h] = w_att[h, l]
    w_bd = jnp.kron(eye_s, w_att.T.astype(f32)).astype(sdt)            # (S*L, S*H)
    b_att_t = jnp.tile(b_att.astype(f32), S).reshape(1, S * H)         # (1, S*H)
    # One-hot lane broadcast (H -> S*H): bcast[h, s*H+h'] = (h == h')
    bcast_h = jnp.tile(jnp.eye(H, dtype=f32), (1, S))                  # (H, S*H)
    # Head-mean + expansion: Emean[s'*H+h, s*L+l] = (s == s') / H
    emean = (jnp.kron(eye_s, jnp.ones((H, L), f32)) / H).astype(sdt)   # (S*H, S*L)
    # Sequence-reduce + projection: W_proj_tiled[s*L+l, m] = W_proj[m, l]
    w_proj_t = jnp.tile(w_proj.T.astype(f32), (S, 1)).astype(sdt)      # (S*L, L)
    b_proj_2d = b_proj.reshape(1, L).astype(f32)                       # (1, L)

    # ---- batch tiling (no jnp.pad: ragged last block handled by Pallas) ----
    block_b = max(8, block_b)
    tb = min(block_b, B)
    if tb < B:
        tb = max(8, (tb // 8) * 8)           # sublane-aligned interior blocks
    elif B >= 16:
        # Keep >= 2 grid steps so both v7x TensorCores get work.
        tb = max(8, _round_up((B + 1) // 2, 8))
    grid = (pl.cdiv(B, tb),)

    kernel = _make_kernel(S, H, L)
    out = pl.pallas_call(
        kernel,
        out_shape=jax.ShapeDtypeStruct((B, L), out_dtype),
        grid_spec=pltpu.PrefetchScalarGridSpec(
            num_scalar_prefetch=0,
            grid=grid,
            in_specs=[
                pl.BlockSpec((tb, S * L), lambda i: (i, 0)),    # x (lane-dense)
                pl.BlockSpec((S * L, S * H), lambda i: (0, 0)), # W_bd (resident)
                pl.BlockSpec((1, S * H), lambda i: (0, 0)),     # b_att tiled
                pl.BlockSpec((H, S * H), lambda i: (0, 0)),     # one-hot bcast
                pl.BlockSpec((S * H, S * L), lambda i: (0, 0)), # Emean
                pl.BlockSpec((S * L, L), lambda i: (0, 0)),     # W_proj tiled
                pl.BlockSpec((1, L), lambda i: (0, 0)),         # b_proj
            ],
            out_specs=pl.BlockSpec((tb, L), lambda i: (i, 0)),
        ),
        compiler_params=pltpu.CompilerParams(
            dimension_semantics=("parallel",),       # megacore across batch tiles
        ),
    )(x2, w_bd, b_att_t, bcast_h, emean, w_proj_t, b_proj_2d)

    return out


def attention_pooling_ref(x, w_att, b_att, w_proj, b_proj):
    """Pure-JAX reference mirroring the PyTorch forward exactly (num_heads > 1)."""
    xf = x.astype(jnp.float32)
    scores = jnp.einsum('bsl,hl->bsh', xf, w_att) + b_att        # nn.Linear(L, H)
    weights = jax.nn.softmax(scores, axis=1)                     # softmax over dim=1
    weighted_x = jnp.einsum('bsl,bsn->bnl', xf, weights)         # (B, H, L)
    pooled = weighted_x.mean(axis=1)                             # num_heads > 1
    pooled = jnp.einsum('bl,ml->bm', pooled, w_proj) + b_proj    # projection Linear
    return pooled


if __name__ == "__main__":
    # Module config: input_dim = 32, num_heads = 4.  Input x: (B, S, input_dim).
    B, S, L, H = 2, 8, 32, 4
    key = jax.random.PRNGKey(0)
    kx, k1, k2, k3, k4, kx2 = jax.random.split(key, 6)

    x = jax.random.normal(kx, (B, S, L), dtype=jnp.float32)

    # Deterministic "nn.Linear"-style params (uniform in +-1/sqrt(fan_in)).
    bound = 1.0 / (L ** 0.5)
    w_att = jax.random.uniform(k1, (H, L), jnp.float32, -bound, bound)
    b_att = jax.random.uniform(k2, (H,), jnp.float32, -bound, bound)
    w_proj = jax.random.uniform(k3, (L, L), jnp.float32, -bound, bound)
    b_proj = jax.random.uniform(k4, (L,), jnp.float32, -bound, bound)

    # --- small-shape check, full-precision (f32) streaming, single tile -----
    out = attention_pooling(x, w_att, b_att, w_proj, b_proj, stream_dtype=None)
    out = jax.block_until_ready(out)
    ref = attention_pooling_ref(x, w_att, b_att, w_proj, b_proj)
    assert out.shape == (B, L)
    assert jnp.allclose(out, ref, atol=5e-3, rtol=5e-3), "mismatch vs reference (f32 path)"

    # --- larger batch: batch tiling, ragged last block (no pad copy), and the
    #     default bf16 streaming path -----------------------------------------
    B2 = 300
    x2 = jax.random.normal(kx2, (B2, S, L), dtype=jnp.float32)
    out2 = attention_pooling(x2, w_att, b_att, w_proj, b_proj, block_b=128)
    out2 = jax.block_until_ready(out2)
    x2_rounded = x2.astype(jnp.bfloat16).astype(jnp.float32)
    ref2 = attention_pooling_ref(x2_rounded, w_att, b_att, w_proj, b_proj)
    assert out2.shape == (B2, L)
    assert jnp.allclose(out2, ref2, atol=3e-2, rtol=3e-2), "mismatch vs reference (bf16 path)"

    print("KERNEL_OK")
</pallas_src>

<mosaic_0001>
module attributes {stable_mosaic.version = 11 : i64} {
  func.func @kernel(%arg0: i32, %arg1: memref<2x256xf32, #tpu.memory_space<vmem>>, %arg2: memref<256x32xf32, #tpu.memory_space<vmem>>, %arg3: memref<1x32xf32, #tpu.memory_space<vmem>>, %arg4: memref<4x32xf32, #tpu.memory_space<vmem>>, %arg5: memref<32x256xf32, #tpu.memory_space<vmem>>, %arg6: memref<256x32xf32, #tpu.memory_space<vmem>>, %arg7: memref<1x32xf32, #tpu.memory_space<vmem>>, %arg8: memref<2x32xf32, #tpu.memory_space<vmem>>) attributes {dimension_semantics = [#tpu.dimension_semantics<parallel>], iteration_bounds = array<i64: 1>, scalar_prefetch = 0 : i64, scratch_operands = 0 : i64, tpu.core_type = #tpu.core_type<tc>, window_params = [{transform_indices = @transform_0, window_bounds = array<i64: 2, 256>}, {pipeline_mode = #tpu.pipeline_mode<synchronous>, transform_indices = @transform_1, window_bounds = array<i64: 256, 32>}, {pipeline_mode = #tpu.pipeline_mode<synchronous>, transform_indices = @transform_2, window_bounds = array<i64: 1, 32>}, {pipeline_mode = #tpu.pipeline_mode<synchronous>, transform_indices = @transform_3, window_bounds = array<i64: 4, 32>}, {pipeline_mode = #tpu.pipeline_mode<synchronous>, transform_indices = @transform_4, window_bounds = array<i64: 32, 256>}, {pipeline_mode = #tpu.pipeline_mode<synchronous>, transform_indices = @transform_5, window_bounds = array<i64: 256, 32>}, {pipeline_mode = #tpu.pipeline_mode<synchronous>, transform_indices = @transform_6, window_bounds = array<i64: 1, 32>}, {transform_indices = @transform_7, window_bounds = array<i64: 2, 32>}]} {
    %c0 = arith.constant 0 : index
    %c0_0 = arith.constant 0 : index
    %0 = vector.load %arg1[%c0, %c0_0] : memref<2x256xf32, #tpu.memory_space<vmem>>, vector<2x256xf32>
    %c0_1 = arith.constant 0 : index
    %c0_2 = arith.constant 0 : index
    %1 = vector.load %arg2[%c0_1, %c0_2] : memref<256x32xf32, #tpu.memory_space<vmem>>, vector<256x32xf32>
    %cst = arith.constant dense<0.000000e+00> : vector<2x32xf32>
    %2 = tpu.matmul %0, %1, %cst {dimension_numbers = #tpu.dot_dimension_numbers<[1], [0], [0], [1], [0, 0, 1, 1], [], []>} : vector<2x256xf32>, vector<256x32xf32>, vector<2x32xf32> -> vector<2x32xf32>
    %c0_3 = arith.constant 0 : index
    %c0_4 = arith.constant 0 : index
    %3 = vector.load %arg3[%c0_3, %c0_4] : memref<1x32xf32, #tpu.memory_space<vmem>>, vector<1x32xf32>
    %4 = vector.broadcast %3 : vector<1x32xf32> to vector<2x32xf32>
    %5 = arith.addf %2, %4 : vector<2x32xf32>
    %c0_5 = arith.constant 0 : index
    %c0_6 = arith.constant 0 : index
    %6 = vector.load %arg4[%c0_5, %c0_6] : memref<4x32xf32, #tpu.memory_space<vmem>>, vector<4x32xf32>
    %7 = vector.extract_strided_slice %5 {offsets = [0, 0], sizes = [2, 16], strides = [1, 1]} : vector<2x32xf32> to vector<2x16xf32>
    %8 = vector.extract_strided_slice %5 {offsets = [0, 16], sizes = [2, 16], strides = [1, 1]} : vector<2x32xf32> to vector<2x16xf32>
    %9 = arith.maximumf %7, %8 : vector<2x16xf32>
    %10 = vector.extract_strided_slice %9 {offsets = [0, 0], sizes = [2, 8], strides = [1, 1]} : vector<2x16xf32> to vector<2x8xf32>
    %11 = vector.extract_strided_slice %9 {offsets = [0, 8], sizes = [2, 8], strides = [1, 1]} : vector<2x16xf32> to vector<2x8xf32>
    %12 = arith.maximumf %10, %11 : vector<2x8xf32>
    %13 = vector.extract_strided_slice %12 {offsets = [0, 0], sizes = [2, 4], strides = [1, 1]} : vector<2x8xf32> to vector<2x4xf32>
    %14 = vector.extract_strided_slice %12 {offsets = [0, 4], sizes = [2, 4], strides = [1, 1]} : vector<2x8xf32> to vector<2x4xf32>
    %15 = arith.maximumf %13, %14 : vector<2x4xf32>
    %cst_7 = arith.constant dense<0.000000e+00> : vector<2x32xf32>
    %16 = tpu.matmul %15, %6, %cst_7 {dimension_numbers = #tpu.dot_dimension_numbers<[1], [0], [0], [1], [0, 0, 1, 1], [], []>} : vector<2x4xf32>, vector<4x32xf32>, vector<2x32xf32> -> vector<2x32xf32>
    %17 = arith.subf %5, %16 : vector<2x32xf32>
    %18 = math.exp %17 : vector<2x32xf32>
    %19 = vector.extract_strided_slice %18 {offsets = [0, 0], sizes = [2, 16], strides = [1, 1]} : vector<2x32xf32> to vector<2x16xf32>
    %20 = vector.extract_strided_slice %18 {offsets = [0, 16], sizes = [2, 16], strides = [1, 1]} : vector<2x32xf32> to vector<2x16xf32>
    %21 = arith.addf %19, %20 : vector<2x16xf32>
    %22 = vector.extract_strided_slice %21 {offsets = [0, 0], sizes = [2, 8], strides = [1, 1]} : vector<2x16xf32> to vector<2x8xf32>
    %23 = vector.extract_strided_slice %21 {offsets = [0, 8], sizes = [2, 8], strides = [1, 1]} : vector<2x16xf32> to vector<2x8xf32>
    %24 = arith.addf %22, %23 : vector<2x8xf32>
    %25 = vector.extract_strided_slice %24 {offsets = [0, 0], sizes = [2, 4], strides = [1, 1]} : vector<2x8xf32> to vector<2x4xf32>
    %26 = vector.extract_strided_slice %24 {offsets = [0, 4], sizes = [2, 4], strides = [1, 1]} : vector<2x8xf32> to vector<2x4xf32>
    %27 = arith.addf %25, %26 : vector<2x4xf32>
    %cst_8 = arith.constant 1.000000e+00 : f32
    %28 = vector.broadcast %cst_8 : f32 to vector<2x4xf32>
    %29 = arith.divf %28, %27 : vector<2x4xf32>
    %cst_9 = arith.constant dense<0.000000e+00> : vector<2x32xf32>
    %30 = tpu.matmul %29, %6, %cst_9 {dimension_numbers = #tpu.dot_dimension_numbers<[1], [0], [0], [1], [0, 0, 1, 1], [], []>} : vector<2x4xf32>, vector<4x32xf32>, vector<2x32xf32> -> vector<2x32xf32>
    %31 = arith.mulf %18, %30 : vector<2x32xf32>
    %c0_10 = arith.constant 0 : index
    %c0_11 = arith.constant 0 : index
    %32 = vector.load %arg5[%c0_10, %c0_11] : memref<32x256xf32, #tpu.memory_space<vmem>>, vector<32x256xf32>
    %cst_12 = arith.constant dense<0.000000e+00> : vector<2x256xf32>
    %33 = tpu.matmul %31, %32, %cst_12 {dimension_numbers = #tpu.dot_dimension_numbers<[1], [0], [0], [1], [0, 0, 1, 1], [], []>} : vector<2x32xf32>, vector<32x256xf32>, vector<2x256xf32> -> vector<2x256xf32>
    %34 = arith.mulf %0, %33 : vector<2x256xf32>
    %c0_13 = arith.constant 0 : index
    %c0_14 = arith.constant 0 : index
    %35 = vector.load %arg6[%c0_13, %c0_14] : memref<256x32xf32, #tpu.memory_space<vmem>>, vector<256x32xf32>
    %cst_15 = arith.constant dense<0.000000e+00> : vector<2x32xf32>
    %36 = tpu.matmul %34, %35, %cst_15 {dimension_numbers = #tpu.dot_dimension_numbers<[1], [0], [0], [1], [0, 0, 1, 1], [], []>} : vector<2x256xf32>, vector<256x32xf32>, vector<2x32xf32> -> vector<2x32xf32>
    %c0_16 = arith.constant 0 : index
    %c0_17 = arith.constant 0 : index
    %37 = vector.load %arg7[%c0_16, %c0_17] : memref<1x32xf32, #tpu.memory_space<vmem>>, vector<1x32xf32>
    %38 = vector.broadcast %37 : vector<1x32xf32> to vector<2x32xf32>
    %39 = arith.addf %36, %38 : vector<2x32xf32>
    %c0_18 = arith.constant 0 : index
    %c0_19 = arith.constant 0 : index
    %40 = vector.load %arg8[%c0_18, %c0_19] : memref<2x32xf32, #tpu.memory_space<vmem>>, vector<2x32xf32>
    tpu.vector_store %arg8[%c0_18, %c0_19], %39 {strides = array<i32>} : memref<2x32xf32, #tpu.memory_space<vmem>>, vector<2x32xf32>,
    return
  }
  func.func @transform_0(%arg0: i32) -> (i32, i32) {
    %c0_i32 = arith.constant 0 : i32
    %c0_i32_0 = arith.constant 0 : i32
    return %arg0, %c0_i32 : i32, i32
  }
  func.func @transform_1(%arg0: i32) -> (i32, i32) {
    %c0_i32 = arith.constant 0 : i32
    %c0_i32_0 = arith.constant 0 : i32
    %c0_i32_1 = arith.constant 0 : i32
    return %c0_i32, %c0_i32_0 : i32, i32
  }
  func.func @transform_2(%arg0: i32) -> (i32, i32) {
    %c0_i32 = arith.constant 0 : i32
    %c0_i32_0 = arith.constant 0 : i32
    %c0_i32_1 = arith.constant 0 : i32
    return %c0_i32, %c0_i32_0 : i32, i32
  }
  func.func @transform_3(%arg0: i32) -> (i32, i32) {
    %c0_i32 = arith.constant 0 : i32
    %c0_i32_0 = arith.constant 0 : i32
    %c0_i32_1 = arith.constant 0 : i32
    return %c0_i32, %c0_i32_0 : i32, i32
  }
  func.func @transform_4(%arg0: i32) -> (i32, i32) {
    %c0_i32 = arith.constant 0 : i32
    %c0_i32_0 = arith.constant 0 : i32
    %c0_i32_1 = arith.constant 0 : i32
    return %c0_i32, %c0_i32_0 : i32, i32
  }
  func.func @transform_5(%arg0: i32) -> (i32, i32) {
    %c0_i32 = arith.constant 0 : i32
    %c0_i32_0 = arith.constant 0 : i32
    %c0_i32_1 = arith.constant 0 : i32
    return %c0_i32, %c0_i32_0 : i32, i32
  }
  func.func @transform_6(%arg0: i32) -> (i32, i32) {
    %c0_i32 = arith.constant 0 : i32
    %c0_i32_0 = arith.constant 0 : i32
    %c0_i32_1 = arith.constant 0 : i32
    return %c0_i32, %c0_i32_0 : i32, i32
  }
  func.func @transform_7(%arg0: i32) -> (i32, i32) {
    %c0_i32 = arith.constant 0 : i32
    %c0_i32_0 = arith.constant 0 : i32
    return %arg0, %c0_i32 : i32, i32
  }
}

</mosaic_0001>

<bundles_post_ra>
// kernel: tpu_custom_call.1
= control target key start
LH: loop header
LB: loop body
LE: loop exit
PB: predicated region body
PF: predicated region fallthrough
CT: control target
= control target key end

     0   :  { %v71_v3 = vlaneseq  ;;  %v765_v8 = vmov 1983009808   ;;  %s1070_s0 = inlined_call_operand.vmem [shape: f32[2,256], index: 0, kind: input, shape index: {}]   ;;  %s1071_s1 = inlined_call_operand.vmem [shape: f32[256,32], index: 1, kind: input, shape index: {}]   ;;  %s1072_s2 = inlined_call_operand.vmem [shape: f32[1,32], index: 2, kind: input, shape index: {}]   ;;  %s1073_s3 = inlined_call_operand.vmem [shape: f32[4,32], index: 3, kind: input, shape index: {}]   ;;  %s1074_s4 = inlined_call_operand.vmem [shape: f32[32,256], index: 4, kind: input, shape index: {}]   ;;  %s1075_s5 = inlined_call_operand.vmem [shape: f32[256,32], index: 5, kind: input, shape index: {}]   ;;  %s1076_s6 = inlined_call_operand.vmem [shape: f32[1,32], index: 6, kind: input, shape index: {}]   ;;  %s1077_s7 = inlined_call_operand.hbm [shape: f32[2,32], index: 7, kind: output, shape index: {}]  }
   0x1   :  { %v44_v0 = vld [vmem:[%s1071_s1 + $0x80] sm:$0xff]  ;;  %v45_v1 = vld [vmem:[%s1071_s1 + $0x88] sm:$0xff]  ;;  %v46_v6 = vld [vmem:[%s1071_s1 + $0x90] sm:$0xff]  ;;  %v69_v9 = vunpack.c.l.s4 %v765_v8 }
   0x2   :  { %v28_v2 = vld [vmem:[%s1071_s1] sm:$0xff]  ;;  %v658_v4 = vpack.c.bf16 %v45_v1, %v44_v0  ;;  %v29_v5 = vld [vmem:[%s1071_s1 + $0x8] sm:$0xff]  ;;  %v47_v7 = vld [vmem:[%s1071_s1 + $0x98] sm:$0xff]  ;;  %v72_v17 = vshrl.u32 %v71_v3, 7 }
   0x3   :  { %v660_v10 = vpack.c.bf16 %v29_v5, %v28_v2  ;;  %v662_v11 = vpack.c.bf16 %v47_v7, %v46_v6  ;;  %v30_v12 = vld [vmem:[%s1071_s1 + $0x10] sm:$0xff]  ;;  %v31_v13 = vld [vmem:[%s1071_s1 + $0x18] sm:$0xff]  ;;  %v48_v14 = vld [vmem:[%s1071_s1 + $0xa0] sm:$0xff]  ;;  %v70_v16 = vunpack.c.0.s8 %v69_v9 }
   0x4   :  { %659 = vmatprep.subr.bf16.mxu0 %v658_v4  ;;  %v49_v15 = vld [vmem:[%s1071_s1 + $0xa8] sm:$0xff]  ;;  %v664_v18 = vpack.c.bf16 %v31_v13, %v30_v12  ;;  %v32_v20 = vld [vmem:[%s1071_s1 + $0x20] sm:$0xff]  ;;  %v50_v22 = vld [vmem:[%s1071_s1 + $0xb0] sm:$0xff] }
   0x5   :  { %661 = vmatpush3.bf16.msra.mxu0 %v660_v10  ;;  %v666_v19 = vpack.c.bf16 %v49_v15, %v48_v14  ;;  %v33_v21 = vld [vmem:[%s1071_s1 + $0x28] sm:$0xff]  ;;  %v51_v23 = vld [vmem:[%s1071_s1 + $0xb8] sm:$0xff]  ;;  %v854_v24 = vsub.s32 %v70_v16, %v72_v17  ;;  %v34_v27 = vld [vmem:[%s1071_s1 + $0x30] sm:$0xff] }
   0x6   :  { %663 = vmatprep.subr.bf16.mxu0 %v662_v11  ;;  %v668_v25 = vpack.c.bf16 %v33_v21, %v32_v20  ;;  %v670_v26 = vpack.c.bf16 %v51_v23, %v50_v22  ;;  %v35_v28 = vld [vmem:[%s1071_s1 + $0x38] sm:$0xff]  ;;  %v52_v29 = vld [vmem:[%s1071_s1 + $0xc0] sm:$0xff]  ;;  %v53_v30 = vld [vmem:[%s1071_s1 + $0xc8] sm:$0xff] }
   0x7   :  { %v871_v31 = vld [vmem:[%s1070_s0] sm:$0xf] }
   0x8   :  { %v74_v32 = vrot.slane %v871_v31, %v854_v24 }
   0x9   :  { %665 = vmatpush3.bf16.msra.mxu0 %v664_v18 }
   0xa   :  { %667 = vmatprep.subr.bf16.mxu0 %v666_v19 }
   0xb   :  { %12 = vsyncpa [#allocation3], 0  ;;  %v672_v33 = vpack.c.bf16 %v35_v28, %v34_v27  ;;  %v674_v34 = vpack.c.bf16 %v53_v30, %v52_v29  ;;  %v36_v35 = vld [vmem:[%s1071_s1 + $0x40] sm:$0xff]  ;;  %v37_v36 = vld [vmem:[%s1071_s1 + $0x48] sm:$0xff]  ;;  %v75_v37 = vcombine.high %v74_v32, %v74_v32  ;;  %s766_s21 = smov 112   ;;  %s767_s22 = smov 120  }
   0xc   :  { %v54_v38 = vld [vmem:[%s1071_s1 + $0xd0] sm:$0xff]  ;;  %v55_v39 = vld [vmem:[%s1071_s1 + $0xd8] sm:$0xff]  ;;  %v676_v40 = vpack.c.bf16 %v37_v36, %v36_v35  ;;  %v56_v44 = vld [vmem:[%s1071_s1 + $0xe0] sm:$0xff]  ;;  %v768_v0 = vmov 0.0   ;;  %vm168_vm0 = vcmask 1043456   ;;  %vm769_vm1 = vmmov 0  }
   0xd   :  { %669 = vmatpush3.bf16.msra.mxu0 %v668_v25  ;;  %142 = vmatprep.mubr.f32.mxu0 %v75_v37  ;;  %v678_v41 = vpack.c.bf16 %v55_v39, %v54_v38  ;;  %v38_v42 = vld [vmem:[%s1071_s1 + $0x50] sm:$0xff]  ;;  %v39_v43 = vld [vmem:[%s1071_s1 + $0x58] sm:$0xff]  ;;  %v57_v45 = vld [vmem:[%s1071_s1 + $0xe8] sm:$0xff]  ;;  %vm164_vm2 = vcmask 31744   ;;  %vm344_vm3 = vcmask 261120   ;;  %vm551_vm4 = vcmask 254976  }
   0xe   :  { %671 = vmatprep.subr.bf16.mxu0 %v670_v26  ;;  %v680_v46 = vpack.c.bf16 %v39_v43, %v38_v42  ;;  %v682_v47 = vpack.c.bf16 %v57_v45, %v56_v44  ;;  %v40_v48 = vld [vmem:[%s1071_s1 + $0x60] sm:$0xff]  ;;  %v41_v49 = vld [vmem:[%s1071_s1 + $0x68] sm:$0xff]  ;;  %v58_v50 = vld [vmem:[%s1071_s1 + $0xf0] sm:$0xff]  ;;  %648 = vmatprep.subr.mxu1 %v768_v0 }
   0xf   :  { %v59_v51 = vld [vmem:[%s1071_s1 + $0xf8] sm:$0xff]  ;;  %v684_v52 = vpack.c.bf16 %v41_v49, %v40_v48  ;;  %v42_v54 = vld [vmem:[%s1071_s1 + $0x70] sm:$0xff]  ;;  %v567_v58 = vld [vmem:[%s1072_s2] ss:$0 sm:$0xff]  ;;  %650 = vmatprep.mubr.msk.f32.mxu1 %vm769_vm1, %v768_v0  ;;  %s770_s2 = smov 124  }
  0x10   :  { %v686_v53 = vpack.c.bf16 %v59_v51, %v58_v50  ;;  %v43_v55 = vld [vmem:[%s1071_s1 + $0x78] sm:$0xff]  ;;  %v148_v1 = vld [vmem:[%s1073_s3] sm:$0xf]  ;;  %v337_v15 = vld [vmem:[%s1074_s4 + $0x8] sm:$0xff] }
  0x11   :  { %673 = vmatpush3.bf16.msra.mxu0 %v672_v33  ;;  %v688_v56 = vpack.c.bf16 %v43_v55, %v42_v54  ;;  %649 = vmatpush3.msk.msra.mxu1 %vm168_vm0, %v148_v1  ;;  %v339_v16 = vld [vmem:[%s1074_s4 + $0x18] sm:$0xff]  ;;  %v336_v17 = vld [vmem:[%s1074_s4] sm:$0xff]  ;;  %v338_v19 = vld [vmem:[%s1074_s4 + $0x10] sm:$0xff] }
  0x12   :  { %675 = vmatprep.subr.bf16.mxu0 %v674_v34  ;;  %653 = vmatprep.subr.mxu1 %v768_v0  ;;  %v690_v18 = vpack.c.bf16 %v339_v16, %v337_v15  ;;  %v341_v20 = vld [vmem:[%s1074_s4 + $0x28] sm:$0xff]  ;;  %v343_v21 = vld [vmem:[%s1074_s4 + $0x38] sm:$0xff]  ;;  %v692_v22 = vpack.c.bf16 %v338_v19, %v336_v17  ;;  %v340_v28 = vld [vmem:[%s1074_s4 + $0x20] sm:$0xff] }
  0x13   :  { %v694_v23 = vpack.c.bf16 %v343_v21, %v341_v20  ;;  %v342_v29 = vld [vmem:[%s1074_s4 + $0x30] sm:$0xff]  ;;  %v448_v33 = vld [vmem:[%s1075_s5 + $0x88] sm:$0xff]  ;;  %v431_v34 = vld [vmem:[%s1075_s5] sm:$0xff] }
  0x14   :  { %v696_v30 = vpack.c.bf16 %v342_v29, %v340_v28  ;;  %v432_v36 = vld [vmem:[%s1075_s5 + $0x8] sm:$0xff]  ;;  %v449_v37 = vld [vmem:[%s1075_s5 + $0x90] sm:$0xff]  ;;  %v450_v38 = vld [vmem:[%s1075_s5 + $0x98] sm:$0xff] }
  0x15   :  { %677 = vmatpush3.bf16.msra.mxu0 %v676_v40  ;;  %v700_v39 = vpack.c.bf16 %v432_v36, %v431_v34  ;;  %v702_v40 = vpack.c.bf16 %v450_v38, %v449_v37  ;;  %v434_v42 = vld [vmem:[%s1075_s5 + $0x18] sm:$0xff]  ;;  %v451_v43 = vld [vmem:[%s1075_s5 + $0xa0] sm:$0xff]  ;;  %v452_v44 = vld [vmem:[%s1075_s5 + $0xa8] sm:$0xff] }
  0x16   :  { %679 = vmatprep.subr.bf16.mxu0 %v678_v41  ;;  %v433_v41 = vld [vmem:[%s1075_s5 + $0x10] sm:$0xff]  ;;  %v436_v48 = vld [vmem:[%s1075_s5 + $0x28] sm:$0xff]  ;;  %v454_v50 = vld [vmem:[%s1075_s5 + $0xb8] sm:$0xff] }
  0x17   :  { %v704_v45 = vpack.c.bf16 %v434_v42, %v433_v41  ;;  %v453_v49 = vld [vmem:[%s1075_s5 + $0xb0] sm:$0xff]  ;;  %v438_v54 = vld [vmem:[%s1075_s5 + $0x38] sm:$0xff]  ;;  %v455_v55 = vld [vmem:[%s1075_s5 + $0xc0] sm:$0xff] }
  0x18   :  { %v445_v15 = vld [vmem:[%s1075_s5 + $0x70] sm:$0xff]  ;;  %v446_v17 = vld [vmem:[%s1075_s5 + $0x78] sm:$0xff]  ;;  %v573_v28 = vld [vmem:[%s1076_s6] ss:$0 sm:$0xff] }
  0x19   :  { %681 = vmatpush3.bf16.msra.mxu0 %v680_v46  ;;  %v706_v46 = vpack.c.bf16 %v452_v44, %v451_v43 }
  0x1a   :  { %683 = vmatprep.subr.bf16.mxu0 %v682_v47  ;;  %v435_v47 = vld [vmem:[%s1075_s5 + $0x20] sm:$0xff] }
  0x1b   :  { %v708_v51 = vpack.c.bf16 %v436_v48, %v435_v47 }
  0x1d   :  { %685 = vmatpush3.bf16.msra.mxu0 %v684_v52  ;;  %v710_v52 = vpack.c.bf16 %v454_v50, %v453_v49 }
  0x1e   :  { %687 = vmatprep.subr.bf16.mxu0 %v686_v53  ;;  %v437_v53 = vld [vmem:[%s1075_s5 + $0x30] sm:$0xff] }
  0x21   :  { %689 = vmatpush3.bf16.msra.mxu0 %v688_v56  ;;  %v456_v56 = vld [vmem:[%s1075_s5 + $0xc8] sm:$0xff] }
  0x22   :  { %691 = vmatprep.subr.bf16.mxu0 %v690_v18  ;;  %v728_v18 = vpack.c.bf16 %v446_v17, %v445_v15 }
  0x24   :  { %143 = vmatmul.mubr.f32.vlgmr.msra.gmra.mrb[0].mxu0 %v74_v32  ;;  %v447_v32 = vld [vmem:[%s1075_s5 + $0x80] sm:$0xff] }
  0x25   :  { %412 = vmatprep.mubr.f32.mxu0 %v768_v0  ;;  %693 = vmatpush1.bf16.msra.mxu0 %v692_v22  ;;  %v698_v35 = vpack.c.bf16 %v448_v33, %v447_v32 }
  0x26   :  { %695 = vmatprep.subr.bf16.mxu0 %v694_v23 }
  0x29   :  { %697 = vmatpush1.bf16.msra.mxu0 %v696_v30 }
  0xf7   :  { %v606_v57 = vpop.f32.mrb[0].mxu0 }
  0xf8   :  { %v607_v59 = vpop.f32.mrb[1].mxu0 }
  0xf9   :  { %v608_v60 = vadd.f32 %v607_v59, %v606_v57  ;;  %v712_v57 = vpack.c.bf16 %v438_v54, %v437_v53  ;;  %v439_v59 = vld [vmem:[%s1075_s5 + $0x40] sm:$0xff] }
  0xfb   :  { %v145_v61 = vadd.f32 %v608_v60, %v567_v58  ;;  %v714_v58 = vpack.c.bf16 %v456_v56, %v455_v55  ;;  %v440_v60 = vld [vmem:[%s1075_s5 + $0x48] sm:$0xff] }
  0xfd   :  { %150 = vrot.lane.b32.xlu0 %v145_v61, %s766_s21 }
 0x16f   :  { %v151_v62 = vpop.permute.xlu0 %150 }
 0x170   :  { %v153_v63 = vmax.f32 %v145_v61, %v151_v62 }
 0x172   :  { %155 = vrot.lane.b32.xlu0 %v153_v63, %s767_s22 }
 0x1e4   :  { %v156_v2 = vpop.permute.xlu0 %155 }
 0x1e5   :  { %v158_v3 = vmax.f32 %v153_v63, %v156_v2  ;;  %v458_v2 = vld [vmem:[%s1075_s5 + $0xd8] sm:$0xff] }
 0x1e7   :  { %160 = vrot.lane.b32.xlu1 %v158_v3, %s770_s2 }
 0x259   :  { %v161_v4 = vpop.permute.xlu1 %160 }
 0x25a   :  { %v163_v5 = vmax.f32 %v158_v3, %v161_v4  ;;  %v441_v4 = vld [vmem:[%s1075_s5 + $0x50] sm:$0xff] }
 0x25c   :  { %651 = vmatmul.mubr.msk.f32.vlgmr.msra.gmra.mrb[0].mxu1 %vm164_vm2, %v163_v5  ;;  %v442_v5 = vld [vmem:[%s1075_s5 + $0x58] sm:$0xff] }
 0x25d   :  { %654 = vmatpush3.msk.msra.mxu1 %vm168_vm0, %v148_v1  ;;  %655 = vmatprep.mubr.msk.f32.mxu1 %vm769_vm1, %v768_v0  ;;  %v457_v1 = vld [vmem:[%s1075_s5 + $0xd0] sm:$0xff] }
 0x25e   :  { %699 = vmatprep.subr.bf16.mxu1 %v698_v35  ;;  %v718_v3 = vpack.c.bf16 %v458_v2, %v457_v1 }
 0x32f   :  { %v238_v6 = vpop.f32.mrb[0].mxu1 }
 0x330   :  { %v242_v7 = vsub.f32 %v145_v61, %v238_v6  ;;  %v652_v8 = vpop.f32.mrb[1].mxu1  ;;  %v716_v61 = vpack.c.bf16 %v440_v60, %v439_v59  ;;  %v720_v6 = vpack.c.bf16 %v442_v5, %v441_v4 }
 0x331   :  { %v460_v8 = vld [vmem:[%s1075_s5 + $0xe8] sm:$0xff] }
 0x332   :  { %v243_v9 = vmul.f32 1.442695, %v242_v7  ;;  %v459_v7 = vld [vmem:[%s1075_s5 + $0xe0] sm:$0xff] }
 0x334   :  { %737 = vpow2.f32 %v243_v9  ;;  %v722_v9 = vpack.c.bf16 %v460_v8, %v459_v7 }
 0x33e   :  { %v925_v10 = vpop.eup %737 }
 0x33f   :  { %246 = vrot.lane.b32.xlu1 %v925_v10, %s766_s21 }
 0x3b1   :  { %v247_v11 = vpop.permute.xlu1 %246 }
 0x3b2   :  { %v249_v12 = vadd.f32 %v925_v10, %v247_v11  ;;  %v444_v11 = vld [vmem:[%s1075_s5 + $0x68] sm:$0xff] }
 0x3b4   :  { %251 = vrot.lane.b32.xlu0 %v249_v12, %s767_s22 }
 0x426   :  { %v252_v13 = vpop.permute.xlu0 %251 }
 0x427   :  { %v254_v14 = vadd.f32 %v252_v13, %v249_v12  ;;  %v461_v13 = vld [vmem:[%s1075_s5 + $0xf0] sm:$0xff] }
 0x429   :  { %256 = vrot.lane.b32.xlu1 %v254_v14, %s770_s2 }
 0x49b   :  { %v257_v25 = vpop.permute.xlu1 %256 }
 0x49c   :  { %v259_v26 = vadd.f32 %v257_v25, %v254_v14  ;;  %v462_v14 = vld [vmem:[%s1075_s5 + $0xf8] sm:$0xff] }
 0x49d   :  { %v726_v16 = vpack.c.bf16 %v462_v14, %v461_v13 }
 0x49e   :  { %739 = vrcp.f32 %v259_v26 }
 0x4a8   :  { %v740_v27 = vpop.eup %739 }
 0x4a9   :  { %656 = vmatmul.mubr.msk.f32.vlgmr.msra.gmra.mrb[2].mxu1 %vm164_vm2, %v740_v27 }
 0x4aa   :  { %701 = vmatpush3.bf16.msra.mxu1 %v700_v39 }
 0x4ab   :  { %703 = vmatprep.subr.bf16.mxu1 %v702_v40 }
 0x4ae   :  { %705 = vmatpush3.bf16.msra.mxu1 %v704_v45 }
 0x4af   :  { %707 = vmatprep.subr.bf16.mxu1 %v706_v46 }
 0x4b2   :  { %709 = vmatpush3.bf16.msra.mxu1 %v708_v51 }
 0x4b3   :  { %711 = vmatprep.subr.bf16.mxu1 %v710_v52 }
 0x4b6   :  { %713 = vmatpush3.bf16.msra.mxu1 %v712_v57 }
 0x4b7   :  { %715 = vmatprep.subr.bf16.mxu1 %v714_v58 }
 0x4ba   :  { %717 = vmatpush3.bf16.msra.mxu1 %v716_v61 }
 0x4bb   :  { %719 = vmatprep.subr.bf16.mxu1 %v718_v3 }
 0x4be   :  { %721 = vmatpush3.bf16.msra.mxu1 %v720_v6 }
 0x4bf   :  { %723 = vmatprep.subr.bf16.mxu1 %v722_v9 }
 0x57c   :  { %v331_v62 = vpop.f32.mrb[2].mxu1 }
 0x57d   :  { %v335_v63 = vmul.f32 %v925_v10, %v331_v62  ;;  %v657_v0 = vpop.f32.mrb[3].mxu1  ;;  %v443_v10 = vld [vmem:[%s1075_s5 + $0x60] sm:$0xff]  ;;  %s771_s5 = smov [#allocation2]  }
 0x57e   :  { %v724_v12 = vpack.c.bf16 %v444_v11, %v443_v10  ;;  %s559_s23 = sshll.u32 %s771_s5, 4  ;;  %s560_s23 = int_to_ptr.vmem [resolvable:$true] %s559_s23 }
 0x57f   :  { %572 = vmatmul.mubr.msk.f32.vlgmr.msra.gmra.mrb[2].mxu0 %vm344_vm3, %v335_v63  ;;  %s741_s2 = scalar_lea.vmem %s560_s23, 32  ;;  %p746_p1 = scmp.lt.s32.totalorder %s560_s23, %s560_s23 }
 0x580   :  { %725 = vmatpush3.bf16.msra.mxu1 %v724_v12  ;;  %p742_p0 = scmp.ne.s32.totalorder %s560_s23, %s741_s2  ;;  %p747_p2 = scmp.lt.s32.totalorder %s741_s2, %s741_s2 }
 0x581   :  { %727 = vmatprep.subr.bf16.mxu1 %v726_v16 }
 0x582   :  { %p748_p3 = por %p747_p2, %p746_p1 }
 0x584   :  { %729 = vmatpush3.bf16.msra.mxu1 %v728_v18  ;;  %p749_p4 = pnand %p748_p3, %p742_p0 }
 0x652   :  { %v414_v19 = vpop.f32.mrb[2].mxu0 }
 0x653   :  { %v416_v20 = vpop.f32.mrb[3].mxu0 }
 0x654   :  { %v421_v21 = vcombine.low %v414_v19, %v416_v20 }
 0x656   :  { %v428_v22 = vrot.slane %v421_v21, %v854_v24 }
 0x658   :  { %v430_v23 = vmul.f32 %v428_v22, %v871_v31 }
 0x65a   :  { %v477_v25 = vrot.slane %v430_v23, %v854_v24 }
 0x65c   :  { %v478_v26 = vcombine.high %v477_v25, %v477_v25 }
 0x65e   :  { %545 = vmatprep.mubr.f32.mxu1 %v478_v26 }
 0x65f   :  { %546 = vmatmul.mubr.f32.vlgmr.msra.gmra.mrb[4].mxu1 %v477_v25 }
 0x732   :  { %v645_v27 = vpop.f32.mrb[4].mxu1 }
 0x733   :  { %v646_v29 = vpop.f32.mrb[5].mxu1 }
 0x734   :  { %v647_v30 = vadd.f32 %v646_v29, %v645_v27 }
 0x736   :  { %v548_v32 = vadd.f32 %v647_v30, %v573_v28 }
 0x738   :  { %552 = vst.msk [vmem:[#allocation2] sm:$0x3] %vm551_vm4, %v548_v32 }
 0x739   :  { %752 = shalt.err (!%p749_p4)
}
 0x73a   :  { %s753_s25 = scalar_lea.hbm %s1077_s7, 32 }
 0x73b   :  { %p754_p5 = scmp.ne.s32.totalorder %s1077_s7, %s753_s25  ;;  %p757_p6 = scmp.lt.u32.totalorder %s753_s25, %s1077_s7 }
 0x73d   :  { %p759_p7 = pnand %p757_p6, %p754_p5 }
 0x73f   :  { %762 = shalt.err (!%p759_p7)
}
 0x740   :  { %562 = dma.vmem_to_hbm [thread:$0]  %s560_s23, 32, %s1077_s7, [#allocation3]  }
 0x741   :  { %763 = dma.done.wait [#allocation3], 32  }
 0x742   :  { %764 = vsyncadd [#allocation3], 4294967264 }
 0x743   :  { %566 = vsyncpa [#allocation3], 1 }

</bundles_post_ra>
